<compile_context>
chip_gen: v6e
topology: v6e:2x2x1
jax: 0.10.0
libtpu: 0.0.40
codegen_flags: <defaults>
</compile_context>

<pallas_src>
import functools
import math

import numpy as np
import jax
import jax.numpy as jnp
from jax import lax
from jax.experimental import pallas as pl
from jax.experimental.pallas import tpu as pltpu


# ----------------------------------------------------------------------------
# Pallas kernels
# ----------------------------------------------------------------------------
def _build_im2col(x_ref, *, NB, HWrp, Wp, KH, KW):
    """Stack the KH*KW shifted lane-slices of each image into one matrix.

    x_ref: (NB, Cin, L) SAME-padded, flattened, width-padded input.
    returns (KH*KW*Cin, NB*HWrp) -- the single deep-K matmul operand.
    """
    cols = []
    for nb in range(NB):                                     # static unroll
        xf = x_ref[nb]                                       # (Cin, L)
        taps = [lax.slice_in_dim(xf, kh * Wp + kw, kh * Wp + kw + HWrp, axis=1)
                for kh in range(KH) for kw in range(KW)]     # KK x (Cin, HWrp)
        cols.append(jnp.concatenate(taps, axis=0))           # (KK*Cin, HWrp)
    return cols[0] if NB == 1 else jnp.concatenate(cols, axis=1)


def _conv_bn_relu_kernel(x_ref, w_ref, b_ref, o_ref, *, NB, HWrp, Wp, KH, KW):
    xs = _build_im2col(x_ref, NB=NB, HWrp=HWrp, Wp=Wp, KH=KH, KW=KW)
    # one MXU matmul, K = KH*KW*Cin, lanes = NB*HWrp (multiple of 128)
    acc = jnp.dot(w_ref[...], xs, preferred_element_type=jnp.float32)
    acc = acc + b_ref[...]                                   # folded bias + BN shift
    out = jnp.maximum(acc, 0.0).astype(o_ref.dtype)
    for nb in range(NB):                                     # lane-dense stores
        o_ref[nb] = lax.slice_in_dim(out, nb * HWrp, (nb + 1) * HWrp, axis=1)


def _conv_bn_spatialmix_relu_kernel(x_ref, w_ref, b_ref, m_ref, p_ref, u_ref,
                                    o_ref, *, NB, HWrp, Wp, KH, KW):
    xs = _build_im2col(x_ref, NB=NB, HWrp=HWrp, Wp=Wp, KH=KH, KW=KW)
    acc = jnp.dot(w_ref[...], xs, preferred_element_type=jnp.float32)
    bn = acc + b_ref[...]                                    # (TCo, NB*HWrp) fp32
    m = m_ref[...]                                           # (TCo, 1) 0/1 mask
    pm = p_ref[...]                                          # (HWrp, S)
    um = u_ref[...]                                          # (S, HWrp)
    for nb in range(NB):
        bnn = lax.slice_in_dim(bn, nb * HWrp, (nb + 1) * HWrp, axis=1)
        # factored avg_pool2d(r) + upsample(r): two rectangular matmuls
        pooled = jnp.dot(
            jnp.dot(bnn.astype(pm.dtype), pm,
                    preferred_element_type=jnp.float32).astype(um.dtype),
            um, preferred_element_type=jnp.float32)
        mixed = jnp.where(m > 0, bnn, pooled)                # 0/1 mask -> select
        o_ref[nb] = jnp.maximum(mixed, 0.0).astype(o_ref.dtype)


# ----------------------------------------------------------------------------
# Wrapper helpers
# ----------------------------------------------------------------------------
def _tpu_vmem_capacity(default=64 * 1024 * 1024):
    try:
        info = pltpu.get_tpu_info()
        for attr in ("vmem_capacity_bytes", "vmem_bytes", "vmem_size_bytes"):
            v = getattr(info, attr, None)
            if v:
                return int(v)
    except Exception:
        pass
    return default


def _pick_nb(N, *, per_nb_bytes, fixed_bytes, budget):
    nb = int(max(1, min(N, 8, (budget - fixed_bytes) // max(per_nb_bytes, 1))))
    while nb > 1 and N % nb:
        nb -= 1
    return nb


# ----------------------------------------------------------------------------
# Wrapper
# ----------------------------------------------------------------------------
def mixed_unit2_forward(x, params, *, repeat_size, order_list, next_type,
                        compute_dtype=jnp.float32, out_dtype=jnp.float32,
                        max_cout_tile=256):
    """bf16 compute_dtype is recommended on v5e/v6e/v7x (fp32 accumulation and
    fp32 elementwise math are kept); pass max_cout_tile=128 on v5e."""
    N, Cin, H, W = x.shape
    r = repeat_size
    w = params["conv_w"]                        # (Cout, Cin, KH, KW)
    b = params["conv_b"]                        # (Cout,)
    gamma, beta = params["bn_gamma"], params["bn_beta"]
    mean, var = params["bn_mean"], params["bn_var"]
    eps = 1e-5
    Cout, Cin_w, KH, KW = w.shape
    assert Cin_w == Cin
    ph, pw = KH // 2, KW // 2
    Hp, Wp = H + 2 * ph, W + 2 * pw
    # pad width so H*Wp2 is a multiple of 128 -> lane-dense vregs / stores
    lane_step = 128 // math.gcd(H, 128)
    Wp2 = ((Wp + lane_step - 1) // lane_step) * lane_step
    HWrp = H * Wp2                              # output rows 0..H-1, halo cols kept
    L = Hp * Wp2 + 2 * pw                       # flattened padded length (+edge pad)
    KK = KH * KW

    # ---- fold every linear stage into the conv weights / bias (wrapper-side) ----
    w_f = w.astype(jnp.float32)
    if order_list[0] is not None:               # stage-A input channel mix + mask
        assert Cin % r == 0
        cid = np.arange(Cin) // r
        mixA = (cid[:, None] == cid[None, :]).astype(np.float32) / r
        mA = np.ones((Cin,), np.float32)
        mA[np.asarray(order_list[0])] = 0.0
        m_effA = np.diag(mA) + np.diag(1.0 - mA) @ mixA            # (Cin, Cin)
        w_f = jnp.einsum("ojhw,ji->oihw", w_f, jnp.asarray(m_effA))
    scale = gamma / jnp.sqrt(var + eps)                            # BN (eval) fold
    w_f = w_f * scale[:, None, None, None]
    bias = beta + (b - mean) * scale                               # (Cout,)

    do_mix = len(order_list) > 1
    spatial_mix = bool(do_mix and next_type == 0)
    if do_mix:
        m2 = np.ones((Cout,), np.float32)
        m2[np.asarray(order_list[1])] = 0.0
    if do_mix and next_type == 1:
        # stage-B channel mix commutes with the affine conv+BN -> fold it too.
        assert Cout % r == 0
        cid = np.arange(Cout) // r
        mixB = (cid[:, None] == cid[None, :]).astype(np.float32) / r
        m_effB = jnp.asarray(np.diag(m2) + np.diag(1.0 - m2) @ mixB)
        w_f = jnp.einsum("po,oihw->pihw", m_effB, w_f)
        bias = m_effB @ bias

    # ---- Cout tiling (pad to a multiple of the tile; padded rows are zero) ----
    tco = Cout if Cout <= max_cout_tile else max_cout_tile
    n_co = -(-Cout // tco)
    Coutp = n_co * tco

    # single deep-K weight matrix: (Cout, KK*Cin), K index = tap*Cin + cin
    w2 = jnp.transpose(w_f, (0, 2, 3, 1)).reshape(Cout, KK * Cin)
    bias_col = bias.reshape(Cout, 1).astype(jnp.float32)
    if Coutp != Cout:
        w2 = jnp.pad(w2, ((0, Coutp - Cout), (0, 0)))
        bias_col = jnp.pad(bias_col, ((0, Coutp - Cout), (0, 0)))
    w2 = w2.astype(compute_dtype)

    # ---- SAME-pad once + flatten (no 9x im2col in HBM, no transposes) ----
    xp = jnp.pad(x.astype(jnp.float32),
                 ((0, 0), (0, 0), (ph, ph), (pw, Wp2 - W - pw)))
    xpf = jnp.pad(xp.reshape(N, Cin, Hp * Wp2), ((0, 0), (0, 0), (pw, pw)))
    xpf = xpf.astype(compute_dtype)

    # ---- stage-B spatial pool/upsample as factored rectangular matmuls ----
    spatial_bytes = 0
    if spatial_mix:
        assert H % r == 0 and W % r == 0
        S = (H // r) * (W // r)
        i_idx = np.arange(HWrp) // Wp2          # output row
        b_idx = np.arange(HWrp) % Wp2           # padded column (halo/pad invalid)
        valid = (b_idx >= pw) & (b_idx < W + pw)
        j_idx = np.clip(b_idx - pw, 0, W - 1)
        blk = (i_idx // r) * (W // r) + (j_idx // r)
        onehot = (blk[:, None] == np.arange(S)[None, :]) & valid[:, None]
        # 0 / 1/r^2 entries: exact in bf16 for power-of-two r
        pool_m = jnp.asarray(onehot.astype(np.float32) / (r * r)).astype(compute_dtype)
        up_m = jnp.asarray(onehot.T.astype(np.float32)).astype(compute_dtype)
        m2_col = jnp.asarray(np.pad(m2, (0, Coutp - Cout),
                                    constant_values=1.0).reshape(Coutp, 1))
        spatial_bytes = 2 * 2 * HWrp * S * jnp.dtype(compute_dtype).itemsize

    # ---- generation-aware VMEM limit and NB (images per grid step) ----
    vmem_cap = _tpu_vmem_capacity()
    vmem_limit = int(min(0.75 * vmem_cap, 100 * 1024 * 1024))
    isz_in = jnp.dtype(compute_dtype).itemsize
    isz_out = jnp.dtype(out_dtype).itemsize
    per_nb = (2 * Cin * L * isz_in              # x double buffer
              + 2 * tco * HWrp * isz_out        # out double buffer
              + KK * Cin * HWrp * isz_in        # im2col stack
              + 2 * tco * HWrp * 4)             # fp32 acc / temporaries
    fixed = 2 * tco * KK * Cin * isz_in + spatial_bytes + (64 << 10)
    NB = _pick_nb(N, per_nb_bytes=per_nb, fixed_bytes=fixed,
                  budget=int(0.6 * vmem_limit))

    # ---- grid: Cout tiles OUTER, batch INNER -> weights stay VMEM-resident ----
    grid = (n_co, N // NB)
    x_spec = pl.BlockSpec((NB, Cin, L), lambda c, n: (n, 0, 0))
    w_spec = pl.BlockSpec((tco, KK * Cin), lambda c, n: (c, 0))
    b_spec = pl.BlockSpec((tco, 1), lambda c, n: (c, 0))
    o_spec = pl.BlockSpec((NB, tco, HWrp), lambda c, n: (n, c, 0))
    cparams = pltpu.CompilerParams(
        dimension_semantics=("parallel", "parallel"),
        vmem_limit_bytes=vmem_limit)

    if spatial_mix:
        kernel = functools.partial(_conv_bn_spatialmix_relu_kernel,
                                   NB=NB, HWrp=HWrp, Wp=Wp2, KH=KH, KW=KW)
        in_specs = [x_spec, w_spec, b_spec,
                    pl.BlockSpec((tco, 1), lambda c, n: (c, 0)),
                    pl.BlockSpec((HWrp, S), lambda c, n: (0, 0)),
                    pl.BlockSpec((S, HWrp), lambda c, n: (0, 0))]
        args = (xpf, w2, bias_col, m2_col, pool_m, up_m)
    else:
        kernel = functools.partial(_conv_bn_relu_kernel,
                                   NB=NB, HWrp=HWrp, Wp=Wp2, KH=KH, KW=KW)
        in_specs = [x_spec, w_spec, b_spec]
        args = (xpf, w2, bias_col)

    out_rows = pl.pallas_call(
        kernel,
        out_shape=jax.ShapeDtypeStruct((N, Coutp, HWrp), out_dtype),
        grid=grid,
        in_specs=in_specs,
        out_specs=o_spec,
        compiler_params=cparams,
    )(*args)

    # (row i, padded col b) layout; drop padded channels + halo/garbage columns
    out = out_rows[:, :Cout, :].reshape(N, Cout, H, Wp2)[:, :, :, pw:pw + W]
    return out


# ----------------------------------------------------------------------------
# Pure-JAX reference (mirrors the PyTorch forward, eval-mode BN)
# ----------------------------------------------------------------------------
def mixed_unit2_reference(x, params, *, repeat_size, order_list, next_type):
    r = repeat_size
    N, C, H, W = x.shape
    w, b = params["conv_w"], params["conv_b"]
    gamma, beta = params["bn_gamma"], params["bn_beta"]
    mean, var = params["bn_mean"], params["bn_var"]
    eps = 1e-5
    Cout = w.shape[0]

    if order_list[0] is not None:
        avg = x.reshape(N, C // r, r, H, W).mean(axis=2)
        avg = jnp.repeat(avg, r, axis=1)
        m = jnp.ones((C,), jnp.float32).at[
            jnp.asarray(order_list[0])].set(0.0).reshape(1, C, 1, 1)
        x = x * m + (1.0 - m) * avg

    conv = lax.conv_general_dilated(
        x, w, (1, 1), ((1, 1), (1, 1)),
        dimension_numbers=("NCHW", "OIHW", "NCHW"),
        precision=lax.Precision.HIGHEST) + b.reshape(1, Cout, 1, 1)
    out = (conv - mean.reshape(1, Cout, 1, 1)) / jnp.sqrt(
        var.reshape(1, Cout, 1, 1) + eps)
    out = out * gamma.reshape(1, Cout, 1, 1) + beta.reshape(1, Cout, 1, 1)

    if len(order_list) > 1:
        m2 = jnp.ones((Cout,), jnp.float32).at[
            jnp.asarray(order_list[1])].set(0.0).reshape(1, Cout, 1, 1)
        if next_type == 0:
            p = out.reshape(N, Cout, H // r, r, W // r, r).mean(axis=(3, 5))
            p = jnp.repeat(jnp.repeat(p, r, axis=2), r, axis=3)
        else:
            p = out.reshape(N, Cout // r, r, H, W).mean(axis=2)
            p = jnp.repeat(p, r, axis=1)
        out = out * m2 + (1.0 - m2) * p
    return jnp.maximum(out, 0.0)


# ----------------------------------------------------------------------------
if __name__ == "__main__":
    key = jax.random.PRNGKey(0)
    N, Cin, H, W = 2, 4, 16, 16
    Cout = 8                      # v (BatchNorm2d(v), conv out channels)
    KH = KW = 3
    repeat_size = 2
    order_list = [[1, 3], [2, 5]]  # [input channels to share, output channels]

    ks = jax.random.split(key, 7)
    x = jax.random.normal(ks[0], (N, Cin, H, W), jnp.float32)
    params = {
        "conv_w": 0.1 * jax.random.normal(ks[1], (Cout, Cin, KH, KW), jnp.float32),
        "conv_b": 0.05 * jax.random.normal(ks[2], (Cout,), jnp.float32),
        "bn_gamma": 1.0 + 0.1 * jax.random.normal(ks[3], (Cout,), jnp.float32),
        "bn_beta": 0.1 * jax.random.normal(ks[4], (Cout,), jnp.float32),
        "bn_mean": 0.1 * jax.random.normal(ks[5], (Cout,), jnp.float32),
        "bn_var": jnp.abs(1.0 + 0.1 * jax.random.normal(ks[6], (Cout,), jnp.float32)),
    }

    # fp32 operands: both stage-B variants (spatial mix kernel / fully-folded kernel)
    for next_type in (0, 1):
        out = mixed_unit2_forward(x, params, repeat_size=repeat_size,
                                  order_list=order_list, next_type=next_type)
        out = jax.block_until_ready(out)
        ref = mixed_unit2_reference(x, params, repeat_size=repeat_size,
                                    order_list=order_list, next_type=next_type)
        assert out.shape == (N, Cout, H, W)
        np.testing.assert_allclose(np.asarray(out), np.asarray(ref),
                                   rtol=2e-3, atol=2e-3)

    # bf16 matmul operands (recommended on all generations), fp32 accumulation
    out_bf = mixed_unit2_forward(x, params, repeat_size=repeat_size,
                                 order_list=order_list, next_type=0,
                                 compute_dtype=jnp.bfloat16)
    out_bf = jax.block_until_ready(out_bf)
    ref0 = mixed_unit2_reference(x, params, repeat_size=repeat_size,
                                 order_list=order_list, next_type=0)
    np.testing.assert_allclose(np.asarray(out_bf), np.asarray(ref0),
                               rtol=3e-2, atol=3e-2)

    print("KERNEL_OK")
</pallas_src>

<mosaic_0001>
module attributes {stable_mosaic.version = 11 : i64} {
  func.func @_conv_bn_spatialmix_relu_kernel(%arg0: i32, %arg1: i32, %arg2: memref<2x4x434xf32, #tpu.memory_space<vmem>>, %arg3: memref<8x36xf32, #tpu.memory_space<vmem>>, %arg4: memref<8x1xf32, #tpu.memory_space<vmem>>, %arg5: memref<8x1xf32, #tpu.memory_space<vmem>>, %arg6: memref<384x64xf32, #tpu.memory_space<vmem>>, %arg7: memref<64x384xf32, #tpu.memory_space<vmem>>, %arg8: memref<2x8x384xf32, #tpu.memory_space<vmem>>) attributes {dimension_semantics = [#tpu.dimension_semantics<parallel>, #tpu.dimension_semantics<parallel>], iteration_bounds = array<i64: 1, 1>, scalar_prefetch = 0 : i64, scratch_operands = 0 : i64, tpu.core_type = #tpu.core_type<tc>, window_params = [{transform_indices = @transform_0, window_bounds = array<i64: 2, 4, 434>}, {transform_indices = @transform_1, window_bounds = array<i64: 8, 36>}, {transform_indices = @transform_2, window_bounds = array<i64: 8, 1>}, {transform_indices = @transform_3, window_bounds = array<i64: 8, 1>}, {pipeline_mode = #tpu.pipeline_mode<synchronous>, transform_indices = @transform_4, window_bounds = array<i64: 384, 64>}, {pipeline_mode = #tpu.pipeline_mode<synchronous>, transform_indices = @transform_5, window_bounds = array<i64: 64, 384>}, {transform_indices = @transform_6, window_bounds = array<i64: 2, 8, 384>}]} {
    %c0 = arith.constant 0 : index
    %c0_0 = arith.constant 0 : index
    %c0_1 = arith.constant 0 : index
    %0 = vector.load %arg2[%c0, %c0_0, %c0_1] : memref<2x4x434xf32, #tpu.memory_space<vmem>>, vector<1x4x434xf32>
    %1 = vector.shape_cast %0 : vector<1x4x434xf32> to vector<4x434xf32>
    %2 = vector.extract_strided_slice %1 {offsets = [0, 0], sizes = [4, 384], strides = [1, 1]} : vector<4x434xf32> to vector<4x384xf32>
    %3 = vector.extract_strided_slice %1 {offsets = [0, 1], sizes = [4, 384], strides = [1, 1]} : vector<4x434xf32> to vector<4x384xf32>
    %4 = vector.extract_strided_slice %1 {offsets = [0, 2], sizes = [4, 384], strides = [1, 1]} : vector<4x434xf32> to vector<4x384xf32>
    %5 = vector.extract_strided_slice %1 {offsets = [0, 24], sizes = [4, 384], strides = [1, 1]} : vector<4x434xf32> to vector<4x384xf32>
    %6 = vector.extract_strided_slice %1 {offsets = [0, 25], sizes = [4, 384], strides = [1, 1]} : vector<4x434xf32> to vector<4x384xf32>
    %7 = vector.extract_strided_slice %1 {offsets = [0, 26], sizes = [4, 384], strides = [1, 1]} : vector<4x434xf32> to vector<4x384xf32>
    %8 = vector.extract_strided_slice %1 {offsets = [0, 48], sizes = [4, 384], strides = [1, 1]} : vector<4x434xf32> to vector<4x384xf32>
    %9 = vector.extract_strided_slice %1 {offsets = [0, 49], sizes = [4, 384], strides = [1, 1]} : vector<4x434xf32> to vector<4x384xf32>
    %10 = vector.extract_strided_slice %1 {offsets = [0, 50], sizes = [4, 384], strides = [1, 1]} : vector<4x434xf32> to vector<4x384xf32>
    %11 = tpu.concatenate %2, %3, %4, %5, %6, %7, %8, %9, %10 in 0 : vector<4x384xf32>, vector<4x384xf32>, vector<4x384xf32>, vector<4x384xf32>, vector<4x384xf32>, vector<4x384xf32>, vector<4x384xf32>, vector<4x384xf32>, vector<4x384xf32> -> vector<36x384xf32>
    %c1 = arith.constant 1 : index
    %c0_2 = arith.constant 0 : index
    %c0_3 = arith.constant 0 : index
    %12 = vector.load %arg2[%c1, %c0_2, %c0_3] : memref<2x4x434xf32, #tpu.memory_space<vmem>>, vector<1x4x434xf32>
    %13 = vector.shape_cast %12 : vector<1x4x434xf32> to vector<4x434xf32>
    %14 = vector.extract_strided_slice %13 {offsets = [0, 0], sizes = [4, 384], strides = [1, 1]} : vector<4x434xf32> to vector<4x384xf32>
    %15 = vector.extract_strided_slice %13 {offsets = [0, 1], sizes = [4, 384], strides = [1, 1]} : vector<4x434xf32> to vector<4x384xf32>
    %16 = vector.extract_strided_slice %13 {offsets = [0, 2], sizes = [4, 384], strides = [1, 1]} : vector<4x434xf32> to vector<4x384xf32>
    %17 = vector.extract_strided_slice %13 {offsets = [0, 24], sizes = [4, 384], strides = [1, 1]} : vector<4x434xf32> to vector<4x384xf32>
    %18 = vector.extract_strided_slice %13 {offsets = [0, 25], sizes = [4, 384], strides = [1, 1]} : vector<4x434xf32> to vector<4x384xf32>
    %19 = vector.extract_strided_slice %13 {offsets = [0, 26], sizes = [4, 384], strides = [1, 1]} : vector<4x434xf32> to vector<4x384xf32>
    %20 = vector.extract_strided_slice %13 {offsets = [0, 48], sizes = [4, 384], strides = [1, 1]} : vector<4x434xf32> to vector<4x384xf32>
    %21 = vector.extract_strided_slice %13 {offsets = [0, 49], sizes = [4, 384], strides = [1, 1]} : vector<4x434xf32> to vector<4x384xf32>
    %22 = vector.extract_strided_slice %13 {offsets = [0, 50], sizes = [4, 384], strides = [1, 1]} : vector<4x434xf32> to vector<4x384xf32>
    %23 = tpu.concatenate %14, %15, %16, %17, %18, %19, %20, %21, %22 in 0 : vector<4x384xf32>, vector<4x384xf32>, vector<4x384xf32>, vector<4x384xf32>, vector<4x384xf32>, vector<4x384xf32>, vector<4x384xf32>, vector<4x384xf32>, vector<4x384xf32> -> vector<36x384xf32>
    %24 = tpu.concatenate %11, %23 in 1 : vector<36x384xf32>, vector<36x384xf32> -> vector<36x768xf32>
    %c0_4 = arith.constant 0 : index
    %c0_5 = arith.constant 0 : index
    %25 = vector.load %arg3[%c0_4, %c0_5] : memref<8x36xf32, #tpu.memory_space<vmem>>, vector<8x36xf32>
    %cst = arith.constant dense<0.000000e+00> : vector<8x768xf32>
    %26 = tpu.matmul %25, %24, %cst {dimension_numbers = #tpu.dot_dimension_numbers<[1], [0], [0], [1], [0, 0, 1, 1], [], []>} : vector<8x36xf32>, vector<36x768xf32>, vector<8x768xf32> -> vector<8x768xf32>
    %c0_6 = arith.constant 0 : index
    %c0_7 = arith.constant 0 : index
    %27 = vector.load %arg4[%c0_6, %c0_7] : memref<8x1xf32, #tpu.memory_space<vmem>>, vector<8x1xf32>
    %28 = vector.broadcast %27 : vector<8x1xf32> to vector<8x768xf32>
    %29 = arith.addf %26, %28 : vector<8x768xf32>
    %c0_8 = arith.constant 0 : index
    %c0_9 = arith.constant 0 : index
    %30 = vector.load %arg5[%c0_8, %c0_9] : memref<8x1xf32, #tpu.memory_space<vmem>>, vector<8x1xf32>
    %c0_10 = arith.constant 0 : index
    %c0_11 = arith.constant 0 : index
    %31 = vector.load %arg6[%c0_10, %c0_11] : memref<384x64xf32, #tpu.memory_space<vmem>>, vector<384x64xf32>
    %c0_12 = arith.constant 0 : index
    %c0_13 = arith.constant 0 : index
    %32 = vector.load %arg7[%c0_12, %c0_13] : memref<64x384xf32, #tpu.memory_space<vmem>>, vector<64x384xf32>
    %33 = vector.extract_strided_slice %29 {offsets = [0, 0], sizes = [8, 384], strides = [1, 1]} : vector<8x768xf32> to vector<8x384xf32>
    %cst_14 = arith.constant dense<0.000000e+00> : vector<8x64xf32>
    %34 = tpu.matmul %33, %31, %cst_14 {dimension_numbers = #tpu.dot_dimension_numbers<[1], [0], [0], [1], [0, 0, 1, 1], [], []>} : vector<8x384xf32>, vector<384x64xf32>, vector<8x64xf32> -> vector<8x64xf32>
    %cst_15 = arith.constant dense<0.000000e+00> : vector<8x384xf32>
    %35 = tpu.matmul %34, %32, %cst_15 {dimension_numbers = #tpu.dot_dimension_numbers<[1], [0], [0], [1], [0, 0, 1, 1], [], []>} : vector<8x64xf32>, vector<64x384xf32>, vector<8x384xf32> -> vector<8x384xf32>
    %cst_16 = arith.constant 0.000000e+00 : f32
    %36 = vector.broadcast %cst_16 : f32 to vector<8x1xf32>
    %37 = arith.cmpf ogt, %30, %36 : vector<8x1xf32>
    %38 = vector.shape_cast %37 : vector<8x1xi1> to vector<8x1xi1>
    %39 = vector.broadcast %38 : vector<8x1xi1> to vector<8x384xi1>
    %40 = arith.select %39, %33, %35 : vector<8x384xi1>, vector<8x384xf32>
    %cst_17 = arith.constant 0.000000e+00 : f32
    %41 = vector.broadcast %cst_17 : f32 to vector<8x384xf32>
    %42 = arith.maximumf %40, %41 : vector<8x384xf32>
    %c0_18 = arith.constant 0 : index
    %c0_19 = arith.constant 0 : index
    %c0_20 = arith.constant 0 : index
    %43 = vector.load %arg8[%c0_18, %c0_19, %c0_20] : memref<2x8x384xf32, #tpu.memory_space<vmem>>, vector<1x8x384xf32>
    %44 = vector.shape_cast %43 : vector<1x8x384xf32> to vector<8x384xf32>
    %45 = vector.shape_cast %42 : vector<8x384xf32> to vector<1x8x384xf32>
    tpu.vector_store %arg8[%c0_18, %c0_19, %c0_20], %45 {strides = array<i32>} : memref<2x8x384xf32, #tpu.memory_space<vmem>>, vector<1x8x384xf32>,
    %46 = vector.extract_strided_slice %29 {offsets = [0, 384], sizes = [8, 384], strides = [1, 1]} : vector<8x768xf32> to vector<8x384xf32>
    %cst_21 = arith.constant dense<0.000000e+00> : vector<8x64xf32>
    %47 = tpu.matmul %46, %31, %cst_21 {dimension_numbers = #tpu.dot_dimension_numbers<[1], [0], [0], [1], [0, 0, 1, 1], [], []>} : vector<8x384xf32>, vector<384x64xf32>, vector<8x64xf32> -> vector<8x64xf32>
    %cst_22 = arith.constant dense<0.000000e+00> : vector<8x384xf32>
    %48 = tpu.matmul %47, %32, %cst_22 {dimension_numbers = #tpu.dot_dimension_numbers<[1], [0], [0], [1], [0, 0, 1, 1], [], []>} : vector<8x64xf32>, vector<64x384xf32>, vector<8x384xf32> -> vector<8x384xf32>
    %cst_23 = arith.constant 0.000000e+00 : f32
    %49 = vector.broadcast %cst_23 : f32 to vector<8x1xf32>
    %50 = arith.cmpf ogt, %30, %49 : vector<8x1xf32>
    %51 = vector.shape_cast %50 : vector<8x1xi1> to vector<8x1xi1>
    %52 = vector.broadcast %51 : vector<8x1xi1> to vector<8x384xi1>
    %53 = arith.select %52, %46, %48 : vector<8x384xi1>, vector<8x384xf32>
    %cst_24 = arith.constant 0.000000e+00 : f32
    %54 = vector.broadcast %cst_24 : f32 to vector<8x384xf32>
    %55 = arith.maximumf %53, %54 : vector<8x384xf32>
    %c1_25 = arith.constant 1 : index
    %c0_26 = arith.constant 0 : index
    %c0_27 = arith.constant 0 : index
    %56 = vector.load %arg8[%c1_25, %c0_26, %c0_27] : memref<2x8x384xf32, #tpu.memory_space<vmem>>, vector<1x8x384xf32>
    %57 = vector.shape_cast %56 : vector<1x8x384xf32> to vector<8x384xf32>
    %58 = vector.shape_cast %55 : vector<8x384xf32> to vector<1x8x384xf32>
    tpu.vector_store %arg8[%c1_25, %c0_26, %c0_27], %58 {strides = array<i32>} : memref<2x8x384xf32, #tpu.memory_space<vmem>>, vector<1x8x384xf32>,
    return
  }
  func.func @transform_0(%arg0: i32, %arg1: i32) -> (i32, i32, i32) {
    %c0_i32 = arith.constant 0 : i32
    %c0_i32_0 = arith.constant 0 : i32
    %c0_i32_1 = arith.constant 0 : i32
    return %arg1, %c0_i32, %c0_i32_0 : i32, i32, i32
  }
  func.func @transform_1(%arg0: i32, %arg1: i32) -> (i32, i32) {
    %c0_i32 = arith.constant 0 : i32
    %c0_i32_0 = arith.constant 0 : i32
    return %arg0, %c0_i32 : i32, i32
  }
  func.func @transform_2(%arg0: i32, %arg1: i32) -> (i32, i32) {
    %c0_i32 = arith.constant 0 : i32
    %c0_i32_0 = arith.constant 0 : i32
    return %arg0, %c0_i32 : i32, i32
  }
  func.func @transform_3(%arg0: i32, %arg1: i32) -> (i32, i32) {
    %c0_i32 = arith.constant 0 : i32
    %c0_i32_0 = arith.constant 0 : i32
    return %arg0, %c0_i32 : i32, i32
  }
  func.func @transform_4(%arg0: i32, %arg1: i32) -> (i32, i32) {
    %c0_i32 = arith.constant 0 : i32
    %c0_i32_0 = arith.constant 0 : i32
    %c0_i32_1 = arith.constant 0 : i32
    return %c0_i32, %c0_i32_0 : i32, i32
  }
  func.func @transform_5(%arg0: i32, %arg1: i32) -> (i32, i32) {
    %c0_i32 = arith.constant 0 : i32
    %c0_i32_0 = arith.constant 0 : i32
    %c0_i32_1 = arith.constant 0 : i32
    return %c0_i32, %c0_i32_0 : i32, i32
  }
  func.func @transform_6(%arg0: i32, %arg1: i32) -> (i32, i32, i32) {
    %c0_i32 = arith.constant 0 : i32
    %c0_i32_0 = arith.constant 0 : i32
    return %arg1, %arg0, %c0_i32 : i32, i32, i32
  }
}

</mosaic_0001>

<bundles_post_ra>
// kernel: tpu_custom_call.1
= control target key start
LH: loop header
LB: loop body
LE: loop exit
PB: predicated region body
PF: predicated region fallthrough
CT: control target
= control target key end

     0   :  { %s2481_s0 = inlined_call_operand.vmem [shape: f32[2,4,434], index: 0, kind: input, shape index: {}]   ;;  %s2482_s1 = inlined_call_operand.vmem [shape: f32[8,36], index: 1, kind: input, shape index: {}]   ;;  %s2483_s2 = inlined_call_operand.vmem [shape: f32[8,1], index: 2, kind: input, shape index: {}]   ;;  %s2484_s3 = inlined_call_operand.vmem [shape: f32[8,1], index: 3, kind: input, shape index: {}]   ;;  %s2485_s4 = inlined_call_operand.vmem [shape: f32[384,64], index: 4, kind: input, shape index: {}]   ;;  %s2486_s5 = inlined_call_operand.vmem [shape: f32[64,384], index: 5, kind: input, shape index: {}]   ;;  %s2487_s6 = inlined_call_operand.hbm [shape: f32[2,8,384], index: 6, kind: output, shape index: {}]  }
   0x1   :  { %v1556_v0 = vld [vmem:[%s2481_s0] sm:$0xff] }
   0x2   :  { %v1560_v1 = vcombine.high %v1556_v0, %v1556_v0 }
   0x3   :  { %11 = vsyncpa [#allocation3], 0  ;;  %s1504_s23 = smov 80   ;;  %s1505_s24 = smov 78   ;;  %v1569_v2 = vld [vmem:[%s2481_s0 + $0x8] sm:$0xff]  ;;  %v30_v4 = vcombine.low %v1556_v0, %v1556_v0  ;;  %v1612_v5 = vld [vmem:[%s2481_s0 + $0x10] sm:$0xff] }
   0x4   :  { %110 = vrot.lane.b32.xlu1 %v1560_v1, %s1504_s23  ;;  %140 = vrot.lane.b32.xlu0 %v1560_v1, %s1505_s24  ;;  %v31_v3 = vcombine.low %v1569_v2, %v1569_v2  ;;  %s1506_s27 = smov 79   ;;  %s1507_s28 = smov 103   ;;  %v1619_v6 = vcombine.high %v1612_v5, %v1612_v5  ;;  %v47_v7 = vcombine.high %v1569_v2, %v1569_v2  ;;  %v2491_v9 = vmov 0.0   ;;  %v1665_v10 = vld [vmem:[%s2481_s0 + $0x18] sm:$0xff]  ;;  %v295_v22 = vld [vmem:[%s2483_s2] sm:$0xff] }
   0x5   :  { %s1508_s29 = smov 102   ;;  %s1509_s30 = smov 126   ;;  %v170_v8 = vcombine.low %v1612_v5, %v1612_v5  ;;  %381 = vmatprep.mubr.f32.mxu0 %v2491_v9  ;;  %452 = vmatprep.mubr.f32.mxu1 %v2491_v9  ;;  %v186_v11 = vcombine.high %v1665_v10, %v1665_v10  ;;  %v171_v12 = vcombine.low %v1665_v10, %v1665_v10  ;;  %vm146_vm0 = vcmask 637952  }
   0x6   :  { %s1510_s7 = smov 104   ;;  %s1511_s8 = smov 127   ;;  %v2488_v15 = vmov 0   ;;  %vm150_vm1 = vcmask 1043456   ;;  %vm131_vm2 = vcmask 646144   ;;  %vm116_vm3 = vcmask 654336  }
   0x7   :  { %1472 = vset.pattern.permute.xlu0 %v2488_v15  ;;  %1473 = vset.pattern.permute.xlu1 %v2488_v15  ;;  %vm86_vm4 = vcmask 842752   ;;  %vm101_vm5 = vcmask 834560   ;;  %vm56_vm6 = vcmask 1031168   ;;  %vm71_vm7 = vcmask 850944   ;;  %v2254_v15 = vld [vmem:[%s2486_s5 + $0x60] sm:$0xff] }
   0x8   :  { %112 = vrot.lane.b32.xlu1 %v1569_v2, %s1504_s23  ;;  %142 = vrot.lane.b32.xlu0 %v1569_v2, %s1505_s24  ;;  %vm40_vm8 = vcmask 1039360   ;;  %vm301_vm9 = vcmask 293888   ;;  %vm1514_vm10 = vmmov 0   ;;  %2527 = vst [vmem:[#allocation16_spill] sm:$0xff] %v2254_v15  ;;  %vm743_vm12 = vcmask 523264  }
   0xc   :  { %127 = vrot.lane.b32.xlu1 %v31_v3, %s1506_s27  ;;  %125 = vrot.lane.b32.xlu0 %v1556_v0, %s1506_s27 }
  0x10   :  { %108 = vrot.lane.b32.xlu1 %v1556_v0, %s1504_s23  ;;  %138 = vrot.lane.b32.xlu0 %v1556_v0, %s1505_s24 }
  0x14   :  { %80 = vrot.lane.b32.xlu1 %v1560_v1, %s1507_s28  ;;  %123 = vrot.lane.b32.xlu0 %v30_v4, %s1506_s27 }
  0x18   :  { %95 = vrot.lane.b32.xlu1 %v1556_v0, %s1508_s29  ;;  %82 = vrot.lane.b32.xlu0 %v1569_v2, %s1507_s28 }
  0x1c   :  { %78 = vrot.lane.b32.xlu1 %v1556_v0, %s1507_s28  ;;  %97 = vrot.lane.b32.xlu0 %v31_v3, %s1508_s29 }
  0x20   :  { %50 = vrot.lane.b32.xlu1 %v1560_v1, %s1509_s30  ;;  %93 = vrot.lane.b32.xlu0 %v30_v4, %s1508_s29 }
  0x24   :  { %65 = vrot.lane.b32.xlu1 %v1556_v0, %s1510_s7  ;;  %52 = vrot.lane.b32.xlu0 %v1569_v2, %s1509_s30 }
  0x28   :  { %48 = vrot.lane.b32.xlu1 %v1556_v0, %s1509_s30  ;;  %67 = vrot.lane.b32.xlu0 %v31_v3, %s1510_s7 }
  0x2c   :  { %34 = vrot.lane.b32.xlu1 %v1556_v0, %s1511_s8  ;;  %63 = vrot.lane.b32.xlu0 %v30_v4, %s1510_s7 }
  0x30   :  { %271 = vrot.lane.b32.xlu1 %v1612_v5, %s1505_s24  ;;  %36 = vrot.lane.b32.xlu0 %v31_v3, %s1511_s8 }
  0x34   :  { %32 = vrot.lane.b32.xlu1 %v30_v4, %s1511_s8  ;;  %273 = vrot.lane.b32.xlu0 %v1619_v6, %s1505_s24  ;;  %v1761_v4 = vld [vmem:[%s2482_s1] sm:$0xff] }
  0x38   :  { %243 = vrot.lane.b32.xlu1 %v1612_v5, %s1504_s23  ;;  %144 = vrot.lane.b32.xlu0 %v47_v7, %s1505_s24 }
  0x3c   :  { %257 = vrot.lane.b32.xlu1 %v170_v8, %s1506_s27  ;;  %245 = vrot.lane.b32.xlu0 %v1619_v6, %s1504_s23 }
  0x40   :  { %114 = vrot.lane.b32.xlu1 %v47_v7, %s1504_s23  ;;  %259 = vrot.lane.b32.xlu0 %v1612_v5, %s1506_s27 }
  0x44   :  { %215 = vrot.lane.b32.xlu1 %v1612_v5, %s1507_s28  ;;  %129 = vrot.lane.b32.xlu0 %v1569_v2, %s1506_s27 }
  0x48   :  { %229 = vrot.lane.b32.xlu1 %v170_v8, %s1508_s29  ;;  %217 = vrot.lane.b32.xlu0 %v1619_v6, %s1507_s28 }
  0x4c   :  { %84 = vrot.lane.b32.xlu1 %v47_v7, %s1507_s28  ;;  %231 = vrot.lane.b32.xlu0 %v1612_v5, %s1508_s29 }
  0x50   :  { %187 = vrot.lane.b32.xlu1 %v1612_v5, %s1509_s30  ;;  %99 = vrot.lane.b32.xlu0 %v1569_v2, %s1508_s29 }
  0x54   :  { %201 = vrot.lane.b32.xlu1 %v170_v8, %s1510_s7  ;;  %189 = vrot.lane.b32.xlu0 %v1619_v6, %s1509_s30 }
  0x58   :  { %54 = vrot.lane.b32.xlu1 %v47_v7, %s1509_s30  ;;  %203 = vrot.lane.b32.xlu0 %v1612_v5, %s1510_s7 }
  0x5c   :  { %172 = vrot.lane.b32.xlu1 %v170_v8, %s1511_s8  ;;  %69 = vrot.lane.b32.xlu0 %v1569_v2, %s1510_s7 }
  0x60   :  { %38 = vrot.lane.b32.xlu1 %v1569_v2, %s1511_s8  ;;  %174 = vrot.lane.b32.xlu0 %v1612_v5, %s1511_s8 }
  0x64   :  { %277 = vrot.lane.b32.xlu1 %v186_v11, %s1505_s24  ;;  %275 = vrot.lane.b32.xlu0 %v1665_v10, %s1505_s24 }
  0x68   :  { %249 = vrot.lane.b32.xlu1 %v186_v11, %s1504_s23  ;;  %247 = vrot.lane.b32.xlu0 %v1665_v10, %s1504_s23 }
  0x6c   :  { %263 = vrot.lane.b32.xlu1 %v1665_v10, %s1506_s27  ;;  %261 = vrot.lane.b32.xlu0 %v171_v12, %s1506_s27 }
  0x70   :  { %221 = vrot.lane.b32.xlu1 %v186_v11, %s1507_s28  ;;  %219 = vrot.lane.b32.xlu0 %v1665_v10, %s1507_s28 }
  0x74   :  { %235 = vrot.lane.b32.xlu1 %v1665_v10, %s1508_s29  ;;  %233 = vrot.lane.b32.xlu0 %v171_v12, %s1508_s29 }
  0x76   :  { %v111_v13 = vpop.permute.xlu1 %110  ;;  %v141_v14 = vpop.permute.xlu0 %140 }
  0x78   :  { %193 = vrot.lane.b32.xlu1 %v186_v11, %s1509_s30  ;;  %191 = vrot.lane.b32.xlu0 %v1665_v10, %s1509_s30 }
  0x7a   :  { %v1695_v16 = vpop.permute.xlu1 %112  ;;  %v1697_v17 = vpop.permute.xlu0 %142 }
  0x7b   :  { %v148_v18 = vsel %vm146_vm0, %v141_v14, %v1697_v17  ;;  %v118_v25 = vsel %vm116_vm3, %v111_v13, %v1695_v16 }
  0x7c   :  { %207 = vrot.lane.b32.xlu1 %v1665_v10, %s1510_s7  ;;  %205 = vrot.lane.b32.xlu0 %v171_v12, %s1510_s7 }
  0x7d   :  { %1215 = vmatprep.subr.msk.mxu0 %vm150_vm1, %v148_v18 }
  0x7e   :  { %v1705_v19 = vpop.permute.xlu1 %127  ;;  %v126_v20 = vpop.permute.xlu0 %125 }
  0x7f   :  { %v133_v21 = vsel %vm131_vm2, %v126_v20, %v1705_v19 }
  0x80   :  { %178 = vrot.lane.b32.xlu1 %v1665_v10, %s1511_s8  ;;  %176 = vrot.lane.b32.xlu0 %v171_v12, %s1511_s8  ;;  %v161_v27 = vsel %vm150_vm1, %v118_v25, %v133_v21 }
  0x82   :  { %v109_v23 = vpop.permute.xlu1 %108  ;;  %v139_v24 = vpop.permute.xlu0 %138 }
  0x83   :  { %v147_v26 = vsel %vm146_vm0, %v139_v24, %v141_v14  ;;  %v117_v30 = vsel %vm116_vm3, %v109_v23, %v111_v13 }
  0x84   :  { %1216 = vmatpush1.msk.msra.mxu0 %vm150_vm1, %v147_v26  ;;  %298 = vperm.xlu0 %1472, %v295_v22  }
  0x85   :  { %341 = vmatprep.subr.mxu0 %v161_v27 }
  0x86   :  { %v81_v28 = vpop.permute.xlu1 %80  ;;  %v124_v29 = vpop.permute.xlu0 %123 }
  0x87   :  { %v132_v31 = vsel %vm131_vm2, %v124_v29, %v126_v20 }
  0x88   :  { %v160_v32 = vsel %vm150_vm1, %v117_v30, %v132_v31 }
  0x89   :  { %342 = vmatpush1.msra.mxu0 %v160_v32 }
  0x8a   :  { %v96_v33 = vpop.permute.xlu1 %95  ;;  %v1723_v34 = vpop.permute.xlu0 %82 }
  0x8b   :  { %v88_v37 = vsel %vm86_vm4, %v81_v28, %v1723_v34 }
  0x8e   :  { %v79_v35 = vpop.permute.xlu1 %78  ;;  %v1725_v36 = vpop.permute.xlu0 %97 }
  0x8f   :  { %v103_v38 = vsel %vm101_vm5, %v96_v33, %v1725_v36  ;;  %v87_v42 = vsel %vm86_vm4, %v79_v35, %v81_v28 }
  0x90   :  { %v158_v39 = vsel %vm150_vm1, %v88_v37, %v103_v38 }
  0x91   :  { %343 = vmatprep.subr.mxu0 %v158_v39 }
  0x92   :  { %v51_v40 = vpop.permute.xlu1 %50  ;;  %v94_v41 = vpop.permute.xlu0 %93 }
  0x93   :  { %v102_v43 = vsel %vm101_vm5, %v94_v41, %v96_v33 }
  0x94   :  { %v157_v44 = vsel %vm150_vm1, %v87_v42, %v102_v43 }
  0x95   :  { %344 = vmatpush1.msra.mxu0 %v157_v44 }
  0x96   :  { %v66_v45 = vpop.permute.xlu1 %65  ;;  %v1735_v46 = vpop.permute.xlu0 %52 }
  0x97   :  { %v58_v49 = vsel %vm56_vm6, %v51_v40, %v1735_v46 }
  0x9a   :  { %v49_v47 = vpop.permute.xlu1 %48  ;;  %v1737_v48 = vpop.permute.xlu0 %67 }
  0x9b   :  { %v73_v50 = vsel %vm71_vm7, %v66_v45, %v1737_v48  ;;  %v57_v54 = vsel %vm56_vm6, %v49_v47, %v51_v40 }
  0x9c   :  { %v155_v51 = vsel %vm150_vm1, %v58_v49, %v73_v50 }
  0x9d   :  { %345 = vmatprep.subr.mxu0 %v155_v51 }
  0x9e   :  { %v35_v52 = vpop.permute.xlu1 %34  ;;  %v64_v53 = vpop.permute.xlu0 %63 }
  0x9f   :  { %v72_v55 = vsel %vm71_vm7, %v64_v53, %v66_v45 }
  0xa0   :  { %v154_v56 = vsel %vm150_vm1, %v57_v54, %v72_v55  ;;  %v1832_v55 = vld [vmem:[%s2485_s4 + $0x78] sm:$0xff] }
  0xa1   :  { %346 = vmatpush1.msra.mxu0 %v154_v56 }
  0xa2   :  { %v272_v57 = vpop.permute.xlu1 %271  ;;  %v1747_v58 = vpop.permute.xlu0 %36 }
  0xa3   :  { %v42_v59 = vsel %vm40_vm8, %v35_v52, %v1747_v58 }
  0xa4   :  { %v152_v60 = vsel %vm150_vm1, %v1560_v1, %v42_v59  ;;  %v1848_v59 = vld [vmem:[%s2485_s4 + $0x70] sm:$0xff] }
  0xa5   :  { %347 = vmatprep.subr.mxu0 %v152_v60  ;;  %v1855_v60 = vld [vmem:[%s2485_s4 + $0xe8] sm:$0xff] }
  0xa6   :  { %v33_v61 = vpop.permute.xlu1 %32  ;;  %v1753_v62 = vpop.permute.xlu0 %273 }
  0xa7   :  { %v41_v63 = vsel %vm40_vm8, %v33_v61, %v35_v52  ;;  %v279_v3 = vsel %vm146_vm0, %v272_v57, %v1753_v62  ;;  %v1862_v61 = vld [vmem:[%s2485_s4 + $0x68] sm:$0xff] }
  0xa8   :  { %1218 = vmatprep.subr.msk.mxu1 %vm150_vm1, %v279_v3  ;;  %v151_v1 = vsel %vm150_vm1, %v1556_v0, %v41_v63  ;;  %v1868_v3 = vld [vmem:[%s2485_s4 + $0xe0] sm:$0xff] }
  0xa9   :  { %348 = vmatpush1.msra.mxu0 %v151_v1  ;;  %v1874_v1 = vld [vmem:[%s2485_s4 + $0x60] sm:$0xff] }
  0xaa   :  { %v244_v7 = vpop.permute.xlu1 %243  ;;  %v145_v8 = vpop.permute.xlu0 %144  ;;  %1217 = vmatmul.mubr.msk.f32.vlgmr.msra.gmra.mxu0 %vm301_vm9, %v1761_v4 }
  0xab   :  { %v149_v11 = vsel %vm146_vm0, %v1697_v17, %v145_v8  ;;  %523 = vmatprep.mubr.f32.mxu0 %v2491_v9 }
  0xac   :  { %1219 = vmatpush1.msk.msra.mxu1 %vm150_vm1, %v149_v11  ;;  %v1887_v11 = vld [vmem:[%s2485_s4 + $0x58] sm:$0xff] }
  0xae   :  { %v258_v12 = vpop.permute.xlu1 %257  ;;  %v1772_v13 = vpop.permute.xlu0 %245 }
  0xaf   :  { %v251_v0 = vsel %vm116_vm3, %v244_v7, %v1772_v13  ;;  %v1880_v7 = vld [vmem:[%s2485_s4 + $0xd8] sm:$0xff] }
  0xb2   :  { %v115_v14 = vpop.permute.xlu1 %114  ;;  %v1774_v18 = vpop.permute.xlu0 %259 }
  0xb3   :  { %v265_v20 = vsel %vm131_vm2, %v258_v12, %v1774_v18  ;;  %v119_v23 = vsel %vm116_vm3, %v1695_v16, %v115_v14 }
  0xb4   :  { %v291_v21 = vsel %vm150_vm1, %v251_v0, %v265_v20  ;;  %v1893_v0 = vld [vmem:[%s2485_s4 + $0xd0] sm:$0xff] }
  0xb5   :  { %412 = vmatprep.subr.mxu1 %v291_v21 }
  0xb6   :  { %v216_v17 = vpop.permute.xlu1 %215  ;;  %v130_v22 = vpop.permute.xlu0 %129 }
  0xb7   :  { %v134_v24 = vsel %vm131_vm2, %v1705_v19, %v130_v22  ;;  %v1904_v22 = vld [vmem:[%s2485_s4 + $0x50] sm:$0xff] }
  0xb8   :  { %v162_v25 = vsel %vm150_vm1, %v119_v23, %v134_v24 }
  0xb9   :  { %413 = vmatpush1.msra.mxu1 %v162_v25 }
  0xba   :  { %v230_v26 = vpop.permute.xlu1 %229  ;;  %v1786_v27 = vpop.permute.xlu0 %217 }
  0xbb   :  { %v223_v30 = vsel %vm86_vm4, %v216_v17, %v1786_v27 }
  0xbe   :  { %v85_v28 = vpop.permute.xlu1 %84  ;;  %v1788_v29 = vpop.permute.xlu0 %231 }
  0xbf   :  { %v237_v31 = vsel %vm101_vm5, %v230_v26, %v1788_v29  ;;  %v89_v33 = vsel %vm86_vm4, %v1723_v34, %v85_v28  ;;  %v1924_v28 = vld [vmem:[%s2485_s4 + $0xc0] sm:$0xff] }
  0xc0   :  { %v288_v16 = vsel %vm150_vm1, %v223_v30, %v237_v31  ;;  %v1930_v30 = vld [vmem:[%s2485_s4 + $0x40] sm:$0xff]  ;;  %v1936_v31 = vld [vmem:[%s2485_s4 + $0xb8] sm:$0xff] }
  0xc1   :  { %414 = vmatprep.subr.mxu1 %v288_v16 }
  0xc2   :  { %v188_v32 = vpop.permute.xlu1 %187  ;;  %v100_v19 = vpop.permute.xlu0 %99 }
  0xc3   :  { %v104_v35 = vsel %vm101_vm5, %v1725_v36, %v100_v19 }
  0xc4   :  { %v159_v37 = vsel %vm150_vm1, %v89_v33, %v104_v35  ;;  %v1949_v35 = vld [vmem:[%s2485_s4 + $0xb0] sm:$0xff] }
  0xc5   :  { %415 = vmatpush1.msra.mxu1 %v159_v37 }
  0xc6   :  { %v202_v38 = vpop.permute.xlu1 %201  ;;  %v1800_v39 = vpop.permute.xlu0 %189 }
  0xc7   :  { %v195_v42 = vsel %vm56_vm6, %v188_v32, %v1800_v39  ;;  %v1943_v32 = vld [vmem:[%s2485_s4 + $0x38] sm:$0xff] }
  0xca   :  { %v55_v40 = vpop.permute.xlu1 %54  ;;  %v1802_v41 = vpop.permute.xlu0 %203 }
  0xcb   :  { %v209_v43 = vsel %vm71_vm7, %v202_v38, %v1802_v41  ;;  %v59_v45 = vsel %vm56_vm6, %v1735_v46, %v55_v40 }
  0xcc   :  { %v285_v34 = vsel %vm150_vm1, %v195_v42, %v209_v43  ;;  %v1960_v42 = vld [vmem:[%s2485_s4 + $0x30] sm:$0xff] }
  0xcd   :  { %416 = vmatprep.subr.mxu1 %v285_v34 }
  0xce   :  { %v173_v44 = vpop.permute.xlu1 %172  ;;  %v70_v36 = vpop.permute.xlu0 %69 }
  0xcf   :  { %v74_v47 = vsel %vm71_vm7, %v1737_v48, %v70_v36  ;;  %v1827_v48 = vld [vmem:[%s2485_s4 + $0xf8] sm:$0xff] }
  0xd0   :  { %v156_v49 = vsel %vm150_vm1, %v59_v45, %v74_v47  ;;  %v1980_v45 = vld [vmem:[%s2485_s4 + $0xa0] sm:$0xff] }
  0xd1   :  { %417 = vmatpush1.msra.mxu1 %v156_v49  ;;  %v1986_v47 = vld [vmem:[%s2485_s4 + $0x20] sm:$0xff]  ;;  %v1992_v49 = vld [vmem:[%s2485_s4 + $0x98] sm:$0xff] }
  0xd2   :  { %v39_v50 = vpop.permute.xlu1 %38  ;;  %v1814_v51 = vpop.permute.xlu0 %174 }
  0xd3   :  { %v43_v52 = vsel %vm40_vm8, %v1747_v58, %v39_v50  ;;  %v180_v53 = vsel %vm40_vm8, %v173_v44, %v1814_v51 }
  0xd4   :  { %v282_v54 = vsel %vm150_vm1, %v1612_v5, %v180_v53  ;;  %v153_v46 = vsel %vm150_vm1, %v1569_v2, %v43_v52  ;;  %v1837_v5 = vld [vmem:[%s2485_s4 + $0xf0] sm:$0xff]  ;;  %v1999_v52 = vld [vmem:[%s2485_s4 + $0x18] sm:$0xff] }
  0xd5   :  { %418 = vmatprep.subr.mxu1 %v282_v54 }
  0xd6   :  { %v278_v56 = vpop.permute.xlu1 %277  ;;  %419 = vmatpush1.msra.mxu1 %v153_v46  ;;  %v276_v57 = vpop.permute.xlu0 %275  ;;  %v2005_v46 = vld [vmem:[%s2485_s4 + $0x90] sm:$0xff] }
  0xd7   :  { %v280_v2 = vsel %vm146_vm0, %v1753_v62, %v276_v57  ;;  %v281_v58 = vsel %vm146_vm0, %v276_v57, %v278_v56  ;;  %1220 = vmatmul.mubr.msk.f32.vlgmr.msra.gmra.mxu1 %vm301_vm9, %v1761_v4  ;;  %1228 = vmatprep.subr.mxu1 %v1827_v48 }
  0xd8   :  { %1221 = vmatprep.subr.msk.mxu0 %vm150_vm1, %v281_v58  ;;  %1229 = vmatpush3.msra.mxu1 %v1832_v55  ;;  %v2016_v58 = vld [vmem:[%s2485_s4 + $0x10] sm:$0xff] }
  0xd9   :  { %1222 = vmatpush1.msk.msra.mxu0 %vm150_vm1, %v280_v2  ;;  %1230 = vmatprep.subr.mxu1 %v1837_v5 }
  0xda   :  { %v250_v62 = vpop.permute.xlu1 %249  ;;  %v248_v63 = vpop.permute.xlu0 %247  ;;  %1231 = vmatpush3.msra.mxu1 %v1848_v59 }
  0xdb   :  { %1232 = vmatprep.subr.mxu1 %v1855_v60  ;;  %v253_v8 = vsel %vm116_vm3, %v248_v63, %v250_v62  ;;  %v252_v20 = vsel %vm116_vm3, %v1772_v13, %v248_v63  ;;  %v1912_v13 = vld [vmem:[%s2485_s4 + $0xc8] sm:$0xff] }
  0xdc   :  { %1233 = vmatpush3.msra.mxu1 %v1862_v61 }
  0xdd   :  { %1234 = vmatprep.subr.mxu1 %v1868_v3 }
  0xde   :  { %v264_v12 = vpop.permute.xlu1 %263  ;;  %v262_v14 = vpop.permute.xlu0 %261  ;;  %1235 = vmatpush3.msra.mxu1 %v1874_v1 }
  0xdf   :  { %v266_v21 = vsel %vm131_vm2, %v1774_v18, %v262_v14  ;;  %v267_v17 = vsel %vm131_vm2, %v262_v14, %v264_v12  ;;  %1236 = vmatprep.subr.mxu1 %v1880_v7  ;;  %v1918_v18 = vld [vmem:[%s2485_s4 + $0x48] sm:$0xff]  ;;  %v2036_v14 = vld [vmem:[%s2485_s4 + $0x80] sm:$0xff] }
  0xe0   :  { %v293_v23 = vsel %vm150_vm1, %v253_v8, %v267_v17  ;;  %v292_v24 = vsel %vm150_vm1, %v252_v20, %v266_v21  ;;  %1237 = vmatpush3.msra.mxu1 %v1887_v11  ;;  %v2045_v17 = vld [vmem:[%s2485_s4] sm:$0xff] }
  0xe1   :  { %483 = vmatprep.subr.mxu0 %v293_v23  ;;  %1238 = vmatprep.subr.mxu1 %v1893_v0 }
  0xe2   :  { %v222_v25 = vpop.permute.xlu1 %221  ;;  %484 = vmatpush1.msra.mxu0 %v292_v24  ;;  %v220_v26 = vpop.permute.xlu0 %219  ;;  %1239 = vmatpush3.msra.mxu1 %v1904_v22 }
  0xe3   :  { %1240 = vmatprep.subr.mxu1 %v1912_v13  ;;  %v225_v16 = vsel %vm86_vm4, %v220_v26, %v222_v25  ;;  %v224_v37 = vsel %vm86_vm4, %v1786_v27, %v220_v26  ;;  %v1968_v27 = vld [vmem:[%s2485_s4 + $0xa8] sm:$0xff]  ;;  %v2086_v25 = vld [vmem:[%s2485_s4 + $0x158] sm:$0xff]  ;;  %v2093_v26 = vld [vmem:[%s2485_s4 + $0x150] sm:$0xff] }
  0xe4   :  { %1241 = vmatpush3.msra.mxu1 %v1918_v18 }
  0xe5   :  { %1242 = vmatprep.subr.mxu1 %v1924_v28 }
  0xe6   :  { %v236_v19 = vpop.permute.xlu1 %235  ;;  %v234_v33 = vpop.permute.xlu0 %233  ;;  %1243 = vmatpush3.msra.mxu1 %v1930_v30 }
  0xe7   :  { %v238_v38 = vsel %vm101_vm5, %v1788_v29, %v234_v33  ;;  %v239_v40 = vsel %vm101_vm5, %v234_v33, %v236_v19  ;;  %1244 = vmatprep.subr.mxu1 %v1936_v31  ;;  %v1974_v29 = vld [vmem:[%s2485_s4 + $0x28] sm:$0xff]  ;;  %v2107_v19 = vld [vmem:[%s2485_s4 + $0x140] sm:$0xff]  ;;  %v2114_v33 = vld [vmem:[%s2485_s4 + $0x138] sm:$0xff] }
  0xe8   :  { %v290_v43 = vsel %vm150_vm1, %v225_v16, %v239_v40  ;;  %v289_v34 = vsel %vm150_vm1, %v224_v37, %v238_v38  ;;  %1245 = vmatpush3.msra.mxu1 %v1943_v32  ;;  %v2100_v16 = vld [vmem:[%s2485_s4 + $0x148] sm:$0xff]  ;;  %v2121_v37 = vld [vmem:[%s2485_s4 + $0x130] sm:$0xff]  ;;  %v2135_v40 = vld [vmem:[%s2485_s4 + $0x120] sm:$0xff] }
  0xe9   :  { %485 = vmatprep.subr.mxu0 %v290_v43  ;;  %1246 = vmatprep.subr.mxu1 %v1949_v35  ;;  %v2128_v38 = vld [vmem:[%s2485_s4 + $0x128] sm:$0xff]  ;;  %v2142_v43 = vld [vmem:[%s2485_s4 + $0x118] sm:$0xff] }
  0xea   :  { %v194_v44 = vpop.permute.xlu1 %193  ;;  %486 = vmatpush1.msra.mxu0 %v289_v34  ;;  %v192_v36 = vpop.permute.xlu0 %191  ;;  %1247 = vmatpush3.msra.mxu1 %v1960_v42  ;;  %v2149_v34 = vld [vmem:[%s2485_s4 + $0x110] sm:$0xff] }
  0xeb   :  { %1248 = vmatprep.subr.mxu1 %v1968_v27  ;;  %v197_v50 = vsel %vm56_vm6, %v192_v36, %v194_v44  ;;  %v196_v56 = vsel %vm56_vm6, %v1800_v39, %v192_v36  ;;  %v2024_v39 = vld [vmem:[%s2485_s4 + $0x88] sm:$0xff]  ;;  %v2165_v36 = vld [vmem:[%s2485_s4 + $0x100] sm:$0xff] }
  0xec   :  { %1249 = vmatpush3.msra.mxu1 %v1974_v29  ;;  %v2158_v44 = vld [vmem:[%s2485_s4 + $0x108] sm:$0xff] }
  0xed   :  { %1250 = vmatprep.subr.mxu1 %v1980_v45 }
  0xee   :  { %v208_v53 = vpop.permute.xlu1 %207  ;;  %v206_v54 = vpop.permute.xlu0 %205  ;;  %1251 = vmatpush3.msra.mxu1 %v1986_v47 }
  0xef   :  { %v210_v57 = vsel %vm71_vm7, %v1802_v41, %v206_v54  ;;  %v211_v2 = vsel %vm71_vm7, %v206_v54, %v208_v53  ;;  %1252 = vmatprep.subr.mxu1 %v1992_v49  ;;  %v2030_v41 = vld [vmem:[%s2485_s4 + $0x8] sm:$0xff] }
  0xf0   :  { %v287_v62 = vsel %vm150_vm1, %v197_v50, %v211_v2  ;;  %v286_v63 = vsel %vm150_vm1, %v196_v56, %v210_v57  ;;  %1253 = vmatpush3.msra.mxu1 %v1999_v52  ;;  %v2174_v50 = vld [vmem:[%s2486_s5 + $0xb0] sm:$0xff] }
  0xf1   :  { %487 = vmatprep.subr.mxu0 %v287_v62  ;;  %1254 = vmatprep.subr.mxu1 %v2005_v46  ;;  %v2188_v62 = vld [vmem:[%s2486_s5 + $0xa8] sm:$0xff] }
  0xf2   :  { %v179_v8 = vpop.permute.xlu1 %178  ;;  %488 = vmatpush1.msra.mxu0 %v286_v63  ;;  %v177_v12 = vpop.permute.xlu0 %176  ;;  %1255 = vmatpush3.msra.mxu1 %v2016_v58  ;;  %v2194_v63 = vld [vmem:[%s2486_s5 + $0x98] sm:$0xff] }
  0xf3   :  { %v181_v20 = vsel %vm40_vm8, %v1814_v51, %v177_v12  ;;  %v182_v21 = vsel %vm40_vm8, %v177_v12, %v179_v8  ;;  %1256 = vmatprep.subr.mxu1 %v2024_v39  ;;  %v2055_v51 = vld [vmem:[%s2485_s4 + $0x178] sm:$0xff]  ;;  %2518 = vst [vmem:[#allocation7_spill] sm:$0xff] %v2194_v63  ;;  %v2200_v8 = vld [vmem:[%s2486_s5 + $0x90] sm:$0xff]  ;;  %v2206_v12 = vld [vmem:[%s2486_s5 + $0x80] sm:$0xff] }
  0xf4   :  { %v284_v23 = vsel %vm150_vm1, %v1665_v10, %v182_v21  ;;  %v283_v24 = vsel %vm150_vm1, %v1619_v6, %v181_v20  ;;  %1257 = vmatpush3.msra.mxu1 %v2030_v41  ;;  %v2065_v6 = vld [vmem:[%s2485_s4 + $0x170] sm:$0xff]  ;;  %v2072_v10 = vld [vmem:[%s2485_s4 + $0x168] sm:$0xff]  ;;  %2519 = vst [vmem:[#allocation8_spill] sm:$0xff] %v2200_v8  ;;  %2520 = vst [vmem:[#allocation9_spill] sm:$0xff] %v2206_v12 }
  0xf5   :  { %489 = vmatprep.subr.mxu0 %v284_v23  ;;  %1258 = vmatprep.subr.mxu1 %v2036_v14  ;;  %v2218_v23 = vld [vmem:[%s2486_s5 + $0xb8] sm:$0xff] }
  0xf6   :  { %490 = vmatpush1.msra.mxu0 %v283_v24  ;;  %1259 = vmatpush3.msra.mxu1 %v2045_v17  ;;  %2522 = vst [vmem:[#allocation11_spill] sm:$0xff] %v2218_v23  ;;  %v2224_v24 = vld [vmem:[%s2486_s5 + $0xa0] sm:$0xff] }
  0xf7   :  { %1223 = vmatmul.mubr.msk.f32.vlgmr.msra.gmra.mxu0 %vm301_vm9, %v1761_v4  ;;  %1350 = vmatprep.subr.mxu0 %v2491_v9  ;;  %v2079_v4 = vld [vmem:[%s2485_s4 + $0x160] sm:$0xff]  ;;  %2523 = vst [vmem:[#allocation12_spill] sm:$0xff] %v2224_v24 }
  0xf8   :  { %1351 = vmatpush3.msra.mxu0 %v2055_v51  ;;  %1382 = vmatprep.mubr.msk.f32.mxu0 %vm1514_vm10, %v2491_v9 }
  0xf9   :  { %1352 = vmatprep.subr.mxu0 %v2491_v9  ;;  %763 = vmatprep.subr.mxu1 %v2174_v50 }
  0xfa   :  { %1353 = vmatpush3.msra.mxu0 %v2065_v6 }
  0xfb   :  { %1354 = vmatprep.subr.mxu0 %v2491_v9 }
  0xfc   :  { %1355 = vmatpush3.msra.mxu0 %v2072_v10 }
  0xfd   :  { %1356 = vmatprep.subr.mxu0 %v2491_v9 }
  0xfe   :  { %1357 = vmatpush3.msra.mxu0 %v2079_v4 }
  0xff   :  { %1358 = vmatprep.subr.mxu0 %v2491_v9  ;;  %v2177_v53 = vpop.permute.xlu0 %298 }
 0x100   :  { %1359 = vmatpush3.msra.mxu0 %v2086_v25 }
 0x101   :  { %1360 = vmatprep.subr.mxu0 %v2491_v9 }
 0x102   :  { %1361 = vmatpush3.msra.mxu0 %v2093_v26 }
 0x103   :  { %1362 = vmatprep.subr.mxu0 %v2491_v9 }
 0x104   :  { %1363 = vmatpush3.msra.mxu0 %v2100_v16 }
 0x105   :  { %1364 = vmatprep.subr.mxu0 %v2491_v9 }
 0x106   :  { %1365 = vmatpush3.msra.mxu0 %v2107_v19 }
 0x107   :  { %1366 = vmatprep.subr.mxu0 %v2491_v9 }
 0x108   :  { %1367 = vmatpush3.msra.mxu0 %v2114_v33 }
 0x109   :  { %1368 = vmatprep.subr.mxu0 %v2491_v9 }
 0x10a   :  { %1369 = vmatpush3.msra.mxu0 %v2121_v37 }
 0x10b   :  { %1370 = vmatprep.subr.mxu0 %v2491_v9 }
 0x10c   :  { %1371 = vmatpush3.msra.mxu0 %v2128_v38 }
 0x10d   :  { %1372 = vmatprep.subr.mxu0 %v2491_v9 }
 0x10e   :  { %1373 = vmatpush3.msra.mxu0 %v2135_v40 }
 0x10f   :  { %1374 = vmatprep.subr.mxu0 %v2491_v9 }
 0x110   :  { %1375 = vmatpush3.msra.mxu0 %v2142_v43 }
 0x111   :  { %1376 = vmatprep.subr.mxu0 %v2491_v9 }
 0x112   :  { %1377 = vmatpush3.msra.mxu0 %v2149_v34 }
 0x113   :  { %1378 = vmatprep.subr.mxu0 %v2491_v9 }
 0x114   :  { %1379 = vmatpush3.msra.mxu0 %v2158_v44 }
 0x115   :  { %1380 = vmatprep.subr.mxu0 %v2491_v9 }
 0x116   :  { %1381 = vmatpush3.msra.mxu0 %v2165_v36 }
 0x117   :  { %1385 = vmatprep.subr.mxu0 %v2491_v9 }
 0x16a   :  { %v383_v54 = vpop.f32.mrf.mxu0 }
 0x16b   :  { %v2180_v57 = vadd.f32 %v383_v54, %v2177_v53  ;;  %v2235_v54 = vld [vmem:[%s2486_s5 + $0x78] sm:$0xff] }
 0x16c   :  { %v385_v56 = vpop.f32.mrf.mxu0  ;;  %2524 = vst [vmem:[#allocation13_spill] sm:$0xff] %v2235_v54 }
 0x16d   :  { %2516 = vst [vmem:[#allocation5_spill] sm:$0xff] %v2180_v57  ;;  %v2183_v2 = vadd.f32 %v385_v56, %v2177_v53  ;;  %v2240_v56 = vld [vmem:[%s2486_s5 + $0x88] sm:$0xff] }
 0x16e   :  { %2525 = vst [vmem:[#allocation14_spill] sm:$0xff] %v2240_v56 }
 0x16f   :  { %2517 = vst [vmem:[#allocation6_spill] sm:$0xff] %v2183_v2  ;;  %667 = vmatprep.mubr.f32.mxu1 %v2183_v2  ;;  %v2259_v2 = vld [vmem:[%s2486_s5 + $0x70] sm:$0xff] }
 0x170   :  { %668 = vmatmul.mubr.f32.vlgmr.msra.gmra.mxu1 %v2180_v57  ;;  %2528 = vst [vmem:[#allocation17_spill] sm:$0xff] %v2259_v2  ;;  %v2276_v57 = vld [vmem:[%s2486_s5 + $0x58] sm:$0xff] }
 0x171   :  { %764 = vmatpush1.msra.mxu1 %v2188_v62  ;;  %811 = vmatprep.mubr.f32.mxu1 %v2491_v9  ;;  %2531 = vst [vmem:[#allocation20_spill] sm:$0xff] %v2276_v57 }
 0x172   :  { %765 = vmatprep.subr.mxu1 %v2194_v63 }
 0x173   :  { %766 = vmatpush1.msra.mxu1 %v2200_v8 }
 0x174   :  { %767 = vmatprep.subr.mxu1 %v2206_v12 }
 0x175   :  { %768 = vmatpush1.msra.mxu1 %v2235_v54  ;;  %v2307_v54 = vld [vmem:[%s2486_s5 + $0x18] sm:$0xff] }
 0x176   :  { %2537 = vst [vmem:[#allocation25_spill] sm:$0xff] %v2307_v54 }
 0x197   :  { %v454_v20 = vpop.f32.mrf.mxu1 }
 0x198   :  { %v2213_v21 = vadd.f32 %v454_v20, %v2177_v53  ;;  %v2245_v20 = vld [vmem:[%s2486_s5 + $0x68] sm:$0xff] }
 0x199   :  { %2526 = vst [vmem:[#allocation15_spill] sm:$0xff] %v2245_v20  ;;  %769 = vmatprep.subr.mxu1 %v2245_v20  ;;  %v2281_v20 = vld [vmem:[%s2486_s5 + $0x38] sm:$0xff] }
 0x19a   :  { %2521 = vst [vmem:[#allocation10_spill] sm:$0xff] %v2213_v21  ;;  %1383 = vmatmul.mubr.f32.vlgmr.msra.gmra.mxu0 %v2213_v21  ;;  %v2264_v21 = vld [vmem:[%s2486_s5 + $0x50] sm:$0xff]  ;;  %770 = vmatpush1.msra.mxu1 %v2254_v15  ;;  %2532 = vst [vmem:[#allocation21_spill] sm:$0xff] %v2281_v20  ;;  %v2533_v15 = vmov 0.0  }
 0x19b   :  { %1386 = vmatpush3.msra.mxu0 %v2218_v23  ;;  %1401 = vmatprep.mubr.msk.f32.mxu0 %vm1514_vm10, %v2491_v9  ;;  %2529 = vst [vmem:[#allocation18_spill] sm:$0xff] %v2264_v21 }
 0x19c   :  { %1387 = vmatprep.subr.mxu0 %v2491_v9  ;;  %771 = vmatprep.subr.mxu1 %v2264_v21  ;;  %v2300_v21 = vld [vmem:[%s2486_s5 + $0x20] sm:$0xff] }
 0x19d   :  { %1388 = vmatpush3.msra.mxu0 %v2224_v24  ;;  %2536 = vst [vmem:[#allocation24_spill] sm:$0xff] %v2300_v21 }
 0x19e   :  { %1389 = vmatprep.subr.mxu0 %v2491_v9 }
 0x19f   :  { %1390 = vmatpush3.msra.mxu0 %v2240_v56  ;;  %v2293_v56 = vld [vmem:[%s2486_s5 + $0x40] sm:$0xff] }
 0x1a0   :  { %1391 = vmatprep.subr.mxu0 %v2491_v9  ;;  %v2271_v9 = vld [vmem:[%s2486_s5 + $0x48] sm:$0xff]  ;;  %2535 = vst [vmem:[#allocation23_spill] sm:$0xff] %v2293_v56 }
 0x1a1   :  { %1392 = vmatpush3.msra.mxu0 %v2259_v2  ;;  %2530 = vst [vmem:[#allocation19_spill] sm:$0xff] %v2271_v9  ;;  %v2288_v2 = vld [vmem:[%s2486_s5 + $0x30] sm:$0xff]  ;;  %772 = vmatpush1.msra.mxu1 %v2271_v9  ;;  %v2312_v9 = vld [vmem:[%s2486_s5 + $0x28] sm:$0xff] }
 0x1a2   :  { %1393 = vmatprep.subr.mxu0 %v2533_v15  ;;  %2534 = vst [vmem:[#allocation22_spill] sm:$0xff] %v2288_v2  ;;  %773 = vmatprep.subr.mxu1 %v2281_v20  ;;  %2538 = vst [vmem:[#allocation26_spill] sm:$0xff] %v2312_v9  ;;  %v2324_v20 = vld [vmem:[%s2486_s5 + $0x8] sm:$0xff] }
 0x1a3   :  { %1394 = vmatpush3.msra.mxu0 %v2276_v57  ;;  %774 = vmatpush1.msra.mxu1 %v2288_v2  ;;  %2539 = vst [vmem:[#allocation27_spill] sm:$0xff] %v2324_v20  ;;  %v2345_v2 = vpop.f32.mrf.mxu1 }
 0x1a4   :  { %1395 = vmatprep.subr.mxu0 %v2533_v15  ;;  %775 = vmatprep.subr.mxu1 %v2300_v21 }
 0x1a5   :  { %1396 = vmatpush3.msra.mxu0 %v2293_v56  ;;  %776 = vmatpush1.msra.mxu1 %v2307_v54  ;;  %v2330_v56 = vld [vmem:[%s2486_s5] sm:$0xff]  ;;  %v2335_v54 = vld [vmem:[%s2486_s5 + $0x10] sm:$0xff] }
 0x1a6   :  { %1397 = vmatprep.subr.mxu0 %v2533_v15  ;;  %777 = vmatprep.subr.mxu1 %v2324_v20  ;;  %2540 = vst [vmem:[#allocation28_spill] sm:$0xff] %v2330_v56  ;;  %2541 = vst [vmem:[#allocation29_spill] sm:$0xff] %v2335_v54  ;;  %v530_v20 = vld [vmem:[%s2484_s3] sm:$0xff]  ;;  %s1515_s3 = smov [#allocation2]  }
 0x1a7   :  { %1398 = vmatpush3.msra.mxu0 %v2312_v9  ;;  %778 = vmatpush1.msra.mxu1 %v2330_v56  ;;  %vm888_vm11 = vcmp.gt.f32.partialorder %v530_v20, 0.0  ;;  %v2542_v9 = vmov 0   ;;  %s1202_s5 = sshll.u32 %s1515_s3, 4  ;;  %s1203_s5 = int_to_ptr.vmem [resolvable:$true] %s1202_s5 }
 0x1a8   :  { %1399 = vmatprep.subr.mxu0 %v2533_v15  ;;  %1289 = vmatprep.subr.mxu1 %v1827_v48  ;;  %v889_v21 = vsel %vm888_vm11, 1, %v2542_v9  ;;  %v2416_v9 = vadd.f32 %v2345_v2, %v2177_v53  ;;  %s1482_s23 = scalar_lea.vmem %s1203_s5, 768  ;;  %p1487_p1 = scmp.lt.s32.totalorder %s1203_s5, %s1203_s5 }
 0x1a9   :  { %1400 = vmatpush3.msra.mxu0 %v2335_v54  ;;  %891 = vperm.xlu1 %1473, %v889_v21   ;;  %p1483_p0 = scmp.ne.s32.totalorder %s1203_s5, %s1482_s23  ;;  %p1488_p2 = scmp.lt.s32.totalorder %s1482_s23, %s1482_s23 }
 0x1aa   :  { %1404 = vmatprep.subr.mxu0 %v2533_v15 }
 0x1ab   :  { %p1489_p3 = por %p1488_p2, %p1487_p1 }
 0x1ad   :  { %p1490_p4 = pnand %p1489_p3, %p1483_p0 }
 0x1b7   :  { %v525_v12 = vpop.f32.mrf.mxu0 }
 0x1b8   :  { %v2350_v23 = vadd.f32 %v525_v12, %v2177_v53 }
 0x1b9   :  { %v2347_v56 = vpop.f32.mrf.mxu0 }
 0x230   :  { %v1260_v57 = vpop.f32.mrf.mxu1 }
 0x232   :  { %v1261_v24 = vpop.f32.mrf.mxu1 }
 0x233   :  { %v1262_v54 = vadd.f32 %v1261_v24, %v1260_v57 }
 0x25a   :  { %v739_v8 = vpop.f32.mrf.mxu0 }
 0x25b   :  { %v740_v48 = vadd.f32 %v1262_v54, %v739_v8 }
 0x25c   :  { %v1384_v63 = vpop.f32.mrf.mxu0 }
 0x25d   :  { %1224 = vmatmul.mubr.msk.f32.vlgmr.msra.gmra.mxu1 %vm743_vm12, %v740_v48  ;;  %1402 = vmatmul.mubr.msk.f32.vlgmr.msra.gmra.mxu0 %vm743_vm12, %v740_v48 }
 0x25e   :  { %1290 = vmatpush3.msra.mxu1 %v1832_v55  ;;  %1405 = vmatpush3.msra.mxu0 %v2055_v51  ;;  %v2420_v55 = vadd.f32 %v2347_v56, %v2177_v53 }
 0x25f   :  { %1291 = vmatprep.subr.mxu1 %v1837_v5  ;;  %967 = vmatprep.mubr.f32.mxu1 %v2350_v23  ;;  %v2543_v5 = vld [vmem:[#allocation11_spill] sm:$0xff] }
 0x260   :  { %1406 = vmatprep.subr.mxu0 %v2533_v15  ;;  %1292 = vmatpush3.msra.mxu1 %v1848_v59  ;;  %v2544_v59 = vld [vmem:[#allocation7_spill] sm:$0xff] }
 0x261   :  { %1407 = vmatpush3.msra.mxu0 %v2065_v6  ;;  %1293 = vmatprep.subr.mxu1 %v1855_v60  ;;  %v2545_v60 = vld [vmem:[#allocation8_spill] sm:$0xff] }
 0x262   :  { %1408 = vmatprep.subr.mxu0 %v2533_v15  ;;  %1294 = vmatpush3.msra.mxu1 %v1862_v61  ;;  %v2546_v61 = vld [vmem:[#allocation12_spill] sm:$0xff] }
 0x263   :  { %1409 = vmatpush3.msra.mxu0 %v2072_v10  ;;  %1295 = vmatprep.subr.mxu1 %v1868_v3  ;;  %v2547_v3 = vld [vmem:[#allocation9_spill] sm:$0xff] }
 0x264   :  { %1410 = vmatprep.subr.mxu0 %v2533_v15  ;;  %1296 = vmatpush3.msra.mxu1 %v1874_v1  ;;  %v2548_v1 = vld [vmem:[#allocation13_spill] sm:$0xff] }
 0x265   :  { %1411 = vmatpush3.msra.mxu0 %v2079_v4  ;;  %1297 = vmatprep.subr.mxu1 %v1880_v7  ;;  %v2549_v7 = vld [vmem:[#allocation14_spill] sm:$0xff] }
 0x266   :  { %1412 = vmatprep.subr.mxu0 %v2533_v15  ;;  %1298 = vmatpush3.msra.mxu1 %v1887_v11  ;;  %v2550_v11 = vld [vmem:[#allocation15_spill] sm:$0xff]  ;;  %v2567_v4 = vld [vmem:[#allocation6_spill] sm:$0xff] }
 0x267   :  { %1413 = vmatpush3.msra.mxu0 %v2086_v25  ;;  %1299 = vmatprep.subr.mxu1 %v1893_v0  ;;  %v2551_v0 = vld [vmem:[#allocation16_spill] sm:$0xff] }
 0x268   :  { %1414 = vmatprep.subr.mxu0 %v2533_v15  ;;  %1300 = vmatpush3.msra.mxu1 %v1904_v22  ;;  %v2552_v22 = vld [vmem:[#allocation17_spill] sm:$0xff] }
 0x269   :  { %1415 = vmatpush3.msra.mxu0 %v2093_v26  ;;  %1301 = vmatprep.subr.mxu1 %v1912_v13  ;;  %v2553_v13 = vld [vmem:[#allocation18_spill] sm:$0xff] }
 0x26a   :  { %1416 = vmatprep.subr.mxu0 %v2533_v15  ;;  %1302 = vmatpush3.msra.mxu1 %v1918_v18  ;;  %v2554_v18 = vld [vmem:[#allocation19_spill] sm:$0xff] }
 0x26b   :  { %1417 = vmatpush3.msra.mxu0 %v2100_v16  ;;  %1303 = vmatprep.subr.mxu1 %v1924_v28  ;;  %v2555_v28 = vld [vmem:[#allocation20_spill] sm:$0xff] }
 0x26c   :  { %1418 = vmatprep.subr.mxu0 %v2533_v15  ;;  %1304 = vmatpush3.msra.mxu1 %v1930_v30  ;;  %v2556_v30 = vld [vmem:[#allocation21_spill] sm:$0xff] }
 0x26d   :  { %1419 = vmatpush3.msra.mxu0 %v2107_v19  ;;  %1305 = vmatprep.subr.mxu1 %v1936_v31  ;;  %v2557_v31 = vld [vmem:[#allocation22_spill] sm:$0xff] }
 0x26e   :  { %1420 = vmatprep.subr.mxu0 %v2533_v15  ;;  %1306 = vmatpush3.msra.mxu1 %v1943_v32  ;;  %v2558_v32 = vld [vmem:[#allocation23_spill] sm:$0xff] }
 0x26f   :  { %1421 = vmatpush3.msra.mxu0 %v2114_v33  ;;  %1307 = vmatprep.subr.mxu1 %v1949_v35  ;;  %v2559_v35 = vld [vmem:[#allocation24_spill] sm:$0xff] }
 0x270   :  { %1422 = vmatprep.subr.mxu0 %v2533_v15  ;;  %1308 = vmatpush3.msra.mxu1 %v1960_v42  ;;  %v2560_v42 = vld [vmem:[#allocation25_spill] sm:$0xff] }
 0x271   :  { %1423 = vmatpush3.msra.mxu0 %v2121_v37  ;;  %1309 = vmatprep.subr.mxu1 %v1968_v27  ;;  %v2561_v27 = vld [vmem:[#allocation26_spill] sm:$0xff] }
 0x272   :  { %1424 = vmatprep.subr.mxu0 %v2533_v15  ;;  %1310 = vmatpush3.msra.mxu1 %v1974_v29  ;;  %v2562_v29 = vld [vmem:[#allocation27_spill] sm:$0xff] }
 0x273   :  { %1425 = vmatpush3.msra.mxu0 %v2128_v38  ;;  %1311 = vmatprep.subr.mxu1 %v1980_v45  ;;  %v2563_v45 = vld [vmem:[#allocation28_spill] sm:$0xff] }
 0x274   :  { %1426 = vmatprep.subr.mxu0 %v2533_v15  ;;  %1312 = vmatpush3.msra.mxu1 %v1986_v47  ;;  %v2564_v47 = vld [vmem:[#allocation29_spill] sm:$0xff] }
 0x275   :  { %1427 = vmatpush3.msra.mxu0 %v2135_v40  ;;  %1313 = vmatprep.subr.mxu1 %v1992_v49  ;;  %v892_v49 = vpop.permute.xlu1 %891 }
 0x276   :  { %1428 = vmatprep.subr.mxu0 %v2533_v15  ;;  %1314 = vmatpush3.msra.mxu1 %v1999_v52  ;;  %vm893_vm13 = vcmp.eq.s32.totalorder %v892_v49, 1 }
 0x277   :  { %1429 = vmatpush3.msra.mxu0 %v2142_v43  ;;  %1315 = vmatprep.subr.mxu1 %v2005_v46 }
 0x278   :  { %1430 = vmatprep.subr.mxu0 %v2533_v15  ;;  %1316 = vmatpush3.msra.mxu1 %v2016_v58  ;;  %v2565_v58 = vld [vmem:[#allocation5_spill] sm:$0xff] }
 0x279   :  { %1431 = vmatpush3.msra.mxu0 %v2149_v34  ;;  %1317 = vmatprep.subr.mxu1 %v2024_v39 }
 0x27a   :  { %1432 = vmatprep.subr.mxu0 %v2533_v15  ;;  %1318 = vmatpush3.msra.mxu1 %v2030_v41  ;;  %v2566_v41 = vld [vmem:[#allocation10_spill] sm:$0xff] }
 0x27b   :  { %1433 = vmatpush3.msra.mxu0 %v2158_v44  ;;  %1319 = vmatprep.subr.mxu1 %v2036_v14 }
 0x27c   :  { %1434 = vmatprep.subr.mxu0 %v2533_v15  ;;  %1320 = vmatpush3.msra.mxu1 %v2045_v17 }
 0x27d   :  { %1435 = vmatpush3.msra.mxu0 %v2165_v36  ;;  %1436 = vmatprep.mubr.msk.f32.mxu0 %vm1514_vm10, %v2533_v15 }
 0x27e   :  { %968 = vmatmul.mubr.f32.vlgmr.msra.gmra.mxu1 %v2416_v9  ;;  %1437 = vmatmul.mubr.f32.vlgmr.msra.gmra.mxu0 %v2420_v55 }
 0x27f   :  { %1062 = vmatprep.subr.mxu1 %v2174_v50  ;;  %1439 = vmatprep.subr.mxu0 %v2533_v15 }
 0x280   :  { %1063 = vmatpush1.msra.mxu1 %v2188_v62  ;;  %1440 = vmatpush3.msra.mxu0 %v2543_v5 }
 0x281   :  { %1064 = vmatprep.subr.mxu1 %v2544_v59  ;;  %1441 = vmatprep.subr.mxu0 %v2533_v15 }
 0x282   :  { %1065 = vmatpush1.msra.mxu1 %v2545_v60  ;;  %1442 = vmatpush3.msra.mxu0 %v2546_v61 }
 0x283   :  { %1066 = vmatprep.subr.mxu1 %v2547_v3  ;;  %1443 = vmatprep.subr.mxu0 %v2533_v15 }
 0x284   :  { %1067 = vmatpush1.msra.mxu1 %v2548_v1  ;;  %1444 = vmatpush3.msra.mxu0 %v2549_v7 }
 0x285   :  { %1068 = vmatprep.subr.mxu1 %v2550_v11  ;;  %1445 = vmatprep.subr.mxu0 %v2533_v15 }
 0x286   :  { %1069 = vmatpush1.msra.mxu1 %v2551_v0  ;;  %1446 = vmatpush3.msra.mxu0 %v2552_v22 }
 0x287   :  { %1070 = vmatprep.subr.mxu1 %v2553_v13  ;;  %1447 = vmatprep.subr.mxu0 %v2533_v15 }
 0x288   :  { %1071 = vmatpush1.msra.mxu1 %v2554_v18  ;;  %1448 = vmatpush3.msra.mxu0 %v2555_v28 }
 0x289   :  { %1072 = vmatprep.subr.mxu1 %v2556_v30  ;;  %1449 = vmatprep.subr.mxu0 %v2533_v15 }
 0x28a   :  { %1073 = vmatpush1.msra.mxu1 %v2557_v31  ;;  %1450 = vmatpush3.msra.mxu0 %v2558_v32 }
 0x28b   :  { %1074 = vmatprep.subr.mxu1 %v2559_v35  ;;  %1451 = vmatprep.subr.mxu0 %v2533_v15 }
 0x28c   :  { %1075 = vmatpush1.msra.mxu1 %v2560_v42  ;;  %1452 = vmatpush3.msra.mxu0 %v2561_v27 }
 0x28d   :  { %1076 = vmatprep.subr.mxu1 %v2562_v29  ;;  %1453 = vmatprep.subr.mxu0 %v2533_v15 }
 0x28e   :  { %1077 = vmatpush1.msra.mxu1 %v2563_v45  ;;  %1110 = vmatprep.mubr.f32.mxu1 %v2533_v15 }
 0x28f   :  { %1454 = vmatpush3.msra.mxu0 %v2564_v47  ;;  %1455 = vmatprep.mubr.msk.f32.mxu0 %vm1514_vm10, %v2533_v15 }
 0x31d   :  { %v813_v52 = vpop.f32.mrf.mxu1  ;;  %v884_v46 = vpop.f32.mrf.mxu0 }
 0x31e   :  { %v894_v39 = vsel %vm893_vm13, %v2565_v58, %v813_v52  ;;  %v896_v14 = vsel %vm893_vm13, %v2566_v41, %v884_v46 }
 0x31f   :  { %v897_v17 = vmax.f32 %v894_v39, 0.0  ;;  %v899_v51 = vmax.f32 %v896_v14, 0.0  ;;  %v815_v6 = vpop.f32.mrf.mxu1  ;;  %v1403_v10 = vpop.f32.mrf.mxu0 }
 0x320   :  { %v895_v25 = vsel %vm893_vm13, %v2567_v4, %v815_v6 }
 0x321   :  { %900 = vst [vmem:[#allocation2] sm:$0xff] %v897_v17  ;;  %902 = vst [vmem:[#allocation2 + $0x10] sm:$0xff] %v899_v51  ;;  %v898_v15 = vmax.f32 %v895_v25, 0.0 }
 0x323   :  { %901 = vst [vmem:[#allocation2 + $0x8] sm:$0xff] %v898_v15 }
 0x33e   :  { %v1321_v26 = vpop.f32.mrf.mxu1  ;;  %v1039_v16 = vpop.f32.mrf.mxu0 }
 0x340   :  { %v1322_v19 = vpop.f32.mrf.mxu1  ;;  %v1438_v33 = vpop.f32.mrf.mxu0 }
 0x341   :  { %v1323_v37 = vadd.f32 %v1322_v19, %v1321_v26 }
 0x343   :  { %v1040_v38 = vadd.f32 %v1323_v37, %v1039_v16 }
 0x345   :  { %1226 = vmatmul.mubr.msk.f32.vlgmr.msra.gmra.mxu1 %vm743_vm12, %v1040_v38  ;;  %1456 = vmatmul.mubr.msk.f32.vlgmr.msra.gmra.mxu0 %vm743_vm12, %v1040_v38 }
 0x405   :  { %v1112_v40 = vpop.f32.mrf.mxu1  ;;  %v1183_v43 = vpop.f32.mrf.mxu0 }
 0x406   :  { %v1187_v34 = vsel %vm893_vm13, %v2416_v9, %v1112_v40  ;;  %v1189_v44 = vsel %vm893_vm13, %v2420_v55, %v1183_v43 }
 0x407   :  { %v1190_v36 = vmax.f32 %v1187_v34, 0.0  ;;  %v1192_v50 = vmax.f32 %v1189_v44, 0.0  ;;  %v1114_v53 = vpop.f32.mrf.mxu1  ;;  %v1457_v57 = vpop.f32.mrf.mxu0 }
 0x408   :  { %v1188_v2 = vsel %vm893_vm13, %v2350_v23, %v1114_v53 }
 0x409   :  { %1194 = vst [vmem:[#allocation2 + $0x18] sm:$0xff] %v1190_v36  ;;  %1196 = vst [vmem:[#allocation2 + $0x28] sm:$0xff] %v1192_v50  ;;  %v1191_v62 = vmax.f32 %v1188_v2, 0.0 }
 0x40b   :  { %1195 = vst [vmem:[#allocation2 + $0x20] sm:$0xff] %v1191_v62 }
 0x40c   :  { %1493 = shalt.err (!%p1490_p4)
}
 0x40d   :  { %s1516_s24 = smov 384   ;;  %s1517_s25 = smov 24  }
 0x40e   :  { %1208 = dma.vmem_to_hbm [thread:$0]  %s1203_s5, 768, %s2487_s6, [#allocation3], %s1516_s24, %s1516_s24, %s1517_s25  }
 0x40f   :  { %1502 = dma.done.wait [#allocation3], 768  }
 0x410   :  { %1503 = vsyncadd [#allocation3], 4294966528 }
 0x411   :  { %1212 = vsyncpa [#allocation3], 1 }

</bundles_post_ra>
